<compile_context>
chip_gen: v7x
topology: tpu7x:2x2x1
jax: 0.10.0
libtpu: 0.0.40
codegen_flags: <defaults>
</compile_context>

<pallas_src>
import numpy as np
import jax
import jax.numpy as jnp
from jax.experimental import pallas as pl
from jax.experimental.pallas import tpu as pltpu

K = 8        # JPEG block size
LANES = 128  # TPU lane width; multiple of K*K = 64 so the table pattern tiles

# Standard JPEG luminance quantization table (transposed, as in jpeg_utils.py:
# `y_table = np.array([...]).T`).
_Y_TABLE_NP = np.array(
    [[16, 11, 10, 16, 24, 40, 51, 61],
     [12, 12, 14, 19, 26, 58, 60, 55],
     [14, 13, 16, 24, 40, 57, 69, 56],
     [14, 17, 22, 29, 51, 87, 80, 62],
     [18, 22, 37, 56, 68, 109, 103, 77],
     [24, 35, 55, 64, 81, 104, 113, 92],
     [49, 64, 78, 87, 103, 121, 120, 101],
     [72, 92, 95, 98, 112, 100, 103, 99]],
    dtype=np.float32).T


def _round_up(x, m):
    return ((x + m - 1) // m) * m


def _dequant_kernel(t_ref, x_ref, o_ref):
    # t_ref: (1, LANES)          -- scaled quant table, resident in VMEM
    # x_ref: (tile_rows, LANES)  -- lane-dense slab of the flattened image
    # o_ref: (tile_rows, LANES)
    # Pure VPU elementwise multiply; the (1,128) row is broadcast once into a
    # vreg and reused across all row vregs of the tile.
    o_ref[...] = x_ref[...] * t_ref[...]


def y_dequantize(image, factor=1.0):
    """image: (..., 8, 8) -> image * (y_table * factor), same shape/dtype."""
    assert image.shape[-2:] == (K, K), "trailing dims must be (8, 8) blocks"
    assert np.ndim(factor) == 0, "factor must be a static scalar"
    orig_shape = image.shape
    dtype = image.dtype
    total = int(np.prod(orig_shape))

    itemsize = np.dtype(dtype).itemsize
    packing = max(1, 4 // itemsize)   # sub-32-bit dtypes pack along sublanes
    sublane = 8 * packing

    # Compile-time scaled table, flattened row-major (matching the flattening
    # of the trailing (8,8) dims) and tiled across the 128 lanes.
    flat_tbl = (_Y_TABLE_NP * float(factor)).astype(np.dtype(dtype)).reshape(-1)
    table_row = np.tile(flat_tbl, LANES // (K * K)).reshape(1, LANES)

    # Lane-dense flat view. Only pad (by 64 elems) when the block count is odd.
    pad = (-total) % LANES            # 0 in the common case, else 64
    flat = image.reshape(-1)
    if pad:
        flat = jnp.pad(flat, (0, pad))
    rows = (total + pad) // LANES
    x2d = flat.reshape(rows, LANES)

    # Tile sizing: ~4 MiB blocks, sublane-packing aligned, and split into at
    # least two grid steps when possible so both v7x TensorCores get work.
    cap = max(sublane, ((4 << 20) // (LANES * itemsize)) // sublane * sublane)
    if rows <= sublane:
        tile_rows = rows              # single full-extent block (exempt rule)
    else:
        half = _round_up(-(-rows // 2), sublane)
        tile_rows = max(sublane, min(cap, half))
    grid = (-(-rows // tile_rows),)   # cdiv; last block may be partial

    out2d = pl.pallas_call(
        _dequant_kernel,
        out_shape=jax.ShapeDtypeStruct((rows, LANES), dtype),
        grid=grid,
        in_specs=[
            pl.BlockSpec((1, LANES), lambda i: (0, 0)),          # table (resident)
            pl.BlockSpec((tile_rows, LANES), lambda i: (i, 0)),  # image slab
        ],
        out_specs=pl.BlockSpec((tile_rows, LANES), lambda i: (i, 0)),
        compiler_params=pltpu.CompilerParams(
            dimension_semantics=("parallel",),
            vmem_limit_bytes=32 << 20,   # keep double-buffering on v5e too
        ),
    )(table_row, x2d)

    flat_out = out2d.reshape(-1)
    if pad:
        flat_out = flat_out[:total]
    return flat_out.reshape(orig_shape)


def y_dequantize_ref(image, factor=1.0):
    """Pure-JAX reference mirroring the PyTorch forward exactly."""
    table = (jnp.asarray(_Y_TABLE_NP) * factor).astype(image.dtype)
    return image * table


if __name__ == "__main__":
    key = jax.random.PRNGKey(0)
    fn = jax.jit(y_dequantize, static_argnames=("factor",))

    # Primary case: B=2, 32x32 image -> 16 blocks of 8x8 -> (2, 16, 8, 8).
    # Exercises the no-pad fast path with a 2-step parallel grid.
    B, H, W = 2, 32, 32
    image = jax.random.normal(
        key, (B, (H // K) * (W // K), K, K), dtype=jnp.float32)
    factor = 2.0
    out = jax.block_until_ready(fn(image, factor=factor))
    ref = y_dequantize_ref(image, factor)
    assert out.shape == image.shape
    assert out.dtype == image.dtype
    assert jnp.allclose(out, ref), "Pallas output mismatches reference"

    # Odd-block-count case: (1, 3, 8, 8) exercises the rare 64-element pad path.
    image2 = jax.random.normal(jax.random.PRNGKey(1), (1, 3, K, K),
                               dtype=jnp.float32)
    out2 = jax.block_until_ready(fn(image2, factor=1.0))
    assert jnp.allclose(out2, y_dequantize_ref(image2, 1.0)), \
        "Pallas output mismatches reference (odd-block case)"

    print("KERNEL_OK")
</pallas_src>

<mosaic_0001>
module attributes {stable_mosaic.version = 11 : i64} {
  func.func @_dequant_kernel(%arg0: i32, %arg1: memref<1x128xf32, #tpu.memory_space<vmem>>, %arg2: memref<8x128xf32, #tpu.memory_space<vmem>>, %arg3: memref<8x128xf32, #tpu.memory_space<vmem>>) attributes {dimension_semantics = [#tpu.dimension_semantics<parallel>], iteration_bounds = array<i64: 2>, scalar_prefetch = 0 : i64, scratch_operands = 0 : i64, tpu.core_type = #tpu.core_type<tc>, window_params = [{pipeline_mode = #tpu.pipeline_mode<synchronous>, transform_indices = @transform_0, window_bounds = array<i64: 1, 128>}, {transform_indices = @transform_1, window_bounds = array<i64: 8, 128>}, {transform_indices = @transform_2, window_bounds = array<i64: 8, 128>}]} {
    %c0 = arith.constant 0 : index
    %c0_0 = arith.constant 0 : index
    %0 = vector.load %arg2[%c0, %c0_0] : memref<8x128xf32, #tpu.memory_space<vmem>>, vector<8x128xf32>
    %c0_1 = arith.constant 0 : index
    %c0_2 = arith.constant 0 : index
    %1 = vector.load %arg1[%c0_1, %c0_2] : memref<1x128xf32, #tpu.memory_space<vmem>>, vector<1x128xf32>
    %2 = vector.broadcast %1 : vector<1x128xf32> to vector<8x128xf32>
    %3 = arith.mulf %0, %2 : vector<8x128xf32>
    %c0_3 = arith.constant 0 : index
    %c0_4 = arith.constant 0 : index
    %4 = vector.load %arg3[%c0_3, %c0_4] : memref<8x128xf32, #tpu.memory_space<vmem>>, vector<8x128xf32>
    tpu.vector_store %arg3[%c0_3, %c0_4], %3 {strides = array<i32>} : memref<8x128xf32, #tpu.memory_space<vmem>>, vector<8x128xf32>,
    return
  }
  func.func @transform_0(%arg0: i32) -> (i32, i32) {
    %c0_i32 = arith.constant 0 : i32
    %c0_i32_0 = arith.constant 0 : i32
    %c0_i32_1 = arith.constant 0 : i32
    return %c0_i32, %c0_i32_0 : i32, i32
  }
  func.func @transform_1(%arg0: i32) -> (i32, i32) {
    %c0_i32 = arith.constant 0 : i32
    %c0_i32_0 = arith.constant 0 : i32
    return %arg0, %c0_i32 : i32, i32
  }
  func.func @transform_2(%arg0: i32) -> (i32, i32) {
    %c0_i32 = arith.constant 0 : i32
    %c0_i32_0 = arith.constant 0 : i32
    return %arg0, %c0_i32 : i32, i32
  }
}

</mosaic_0001>

<bundles_post_ra>
// kernel: y_dequantize.1
= control target key start
LH: loop header
LB: loop body
LE: loop exit
PB: predicated region body
PF: predicated region fallthrough
CT: control target
= control target key end

     0   :  { %s224_s9 = smov 0   ;;  %s252_s0 = inlined_call_operand.vmem [shape: f32[1,128], index: 0, kind: input, shape index: {}]   ;;  %s253_s1 = inlined_call_operand.vmem [shape: f32[16,128], index: 1, kind: input, shape index: {}]   ;;  %s254_s2 = inlined_call_operand.vmem [shape: f32[16,128], index: 2, kind: output, shape index: {}]  }
   0x1 LB: > { %s202_s10 = sadd.s32 4294967295, %s226_s9   ;;  %p206_p0 = scmp.ge.s32.totalorder %s226_s9, 1  ;;  %s226_s9 = sphi %s224_s9, %s12_s9  }
   0x2   : > { %p111_p1 = scmp.lt.s32.totalorder %s226_s9, 3 }
   0x4   : > { %p112_p2 = pnand %p206_p0, %p111_p1 }
   0x5   : > { %p131_p3 = scmp.lt.s32.totalorder (!%p112_p2), %s202_s10, 1  ;;  %v209_v0 = vld [vmem:[%s252_s0] ss:$0 sm:$0xff] (!%p112_p2) }
   0x6   : > { %115 = sbr.rel (%p112_p2) target bundleno = 20 (0x14), region = 28 }
   0xd   : > { %s256_s10 = smov (!%p131_p3, %s202_s10), 1 }
   0xe   : > { %s207_s11 = sshll.u32 %s256_s10, 3 }
   0xf   : > { %s134_s16 = scalar_lea.vmem %s253_s1, %s207_s11  ;;  %s138_s19 = scalar_lea.vmem %s254_s2, %s207_s11 }
  0x10   : > { %v139_v1 = vld [vmem:[%s134_s16] sm:$0xff] }
  0x11   : > { %v147_v2 = vmul.f32 %v209_v0, %v139_v1 }
  0x13   : > { %148 = vst [vmem:[%s138_s19] sm:$0xff] %v147_v2 }
  0x14 PF: > { %s12_s9 = sadd.s32 1, %s226_s9  }
  0x15   : > { %p9_p4 = scmp.ge.s32.totalorder %s12_s9, 4  }
  0x17   :  { %11 = sbr.rel (!%p9_p4) target bundleno = 1 (0x1), region = 58 }

</bundles_post_ra>
